<compile_context>
chip_gen: v6e
topology: v6e:2x2x1
jax: 0.10.0
libtpu: 0.0.40
codegen_flags: <defaults>
</compile_context>

<pallas_src>
import functools
import math

import jax
import jax.numpy as jnp
from jax import lax
from jax.experimental import pallas as pl
from jax.experimental.pallas import tpu as pltpu
import numpy as np

_LOG2E = math.log2(math.e)


# --------------------------------------------------------------------------
# Kernel body
# --------------------------------------------------------------------------
def _attn_step(q_ref, k_ref, v_ref, o_ref, m_scr, l_scr, acc_scr, *,
               heads, head_dim, kvm_ref=None, qm_ref=None,
               valid_s_last=None, approx_recip=False, exp_dtype=None):
    """One (n, L-tile, S-tile) grid step; all `heads` heads handled per step."""
    si = pl.program_id(2)
    ns = pl.num_programs(2)

    @pl.when(si == 0)
    def _init():
        m_scr[...] = jnp.full_like(m_scr, -jnp.inf)
        l_scr[...] = jnp.zeros_like(l_scr)
        acc_scr[...] = jnp.zeros_like(acc_scr)

    # Column (key) mask for this S tile, if any.
    if kvm_ref is not None:
        colmask = kvm_ref[0]                               # (1, bs) in {0,1} f32; pads already 0
    elif valid_s_last is not None:
        # No user mask, but S was padded: mask pad columns of the last tile only.
        bs = k_ref.shape[2]
        lane = lax.broadcasted_iota(jnp.int32, (1, bs), 1)
        limit = jnp.where(si == ns - 1, valid_s_last, bs)
        colmask = (lane < limit).astype(jnp.float32)
    else:
        colmask = None

    for h in range(heads):                                  # static unroll
        q = q_ref[0, h]                                     # (bl, D), pre-scaled by temp*log2(e)
        k = k_ref[0, h]                                     # (bs, D)
        v = v_ref[0, h]                                     # (bs, D)

        # Scores in log2 domain; contract on D (no materialized k.T), f32 acc.
        s = lax.dot_general(q, k, (((1,), (1,)), ((), ())),
                            preferred_element_type=jnp.float32)      # (bl, bs)

        m_prev = m_scr[h]                                   # (bl, 1)
        m_new = jnp.maximum(m_prev, jnp.max(s, axis=-1, keepdims=True))
        alpha = jnp.exp2(m_prev - m_new)

        x = s - m_new
        if exp_dtype is not None:                           # optional bf16 EUP exp (v6e/v7x)
            x = x.astype(exp_dtype)
        p = jnp.exp2(x)                                     # unnormalized probabilities
        if colmask is not None:
            p = p * colmask.astype(p.dtype)                 # zero out masked / padded keys

        if p.dtype == jnp.float32:
            p_sum = jnp.sum(p, axis=-1, keepdims=True)
        else:
            p_sum = jnp.sum(p.astype(jnp.float32), axis=-1, keepdims=True)

        l_scr[h] = alpha * l_scr[h] + p_sum
        acc_scr[h] = alpha * acc_scr[h] + lax.dot_general(
            p.astype(v.dtype), v, (((1,), (0,)), ((), ())),
            preferred_element_type=jnp.float32)
        m_scr[h] = m_new

    @pl.when(si == ns - 1)
    def _finalize():
        for h in range(heads):
            l = l_scr[h]
            if kvm_ref is not None:
                # Fully key-masked rows have acc == 0 and l == 0: guard the
                # reciprocal so they come out exactly 0 (PyTorch yields NaN).
                l = jnp.where(l == 0.0, 1.0, l)
            out_h = acc_scr[h] * pl.reciprocal(l, approx=approx_recip)
            if qm_ref is not None:
                out_h = out_h * qm_ref[0]                   # (bl, 1) row mask in {0,1}
            # Lane-dense output slab: head h occupies lanes [h*D, (h+1)*D).
            o_ref[0, :, h * head_dim:(h + 1) * head_dim] = out_h.astype(o_ref.dtype)


def _masked_kernel(qm_ref, kvm_ref, q_ref, k_ref, v_ref, o_ref,
                   m_scr, l_scr, acc_scr, **kw):
    _attn_step(q_ref, k_ref, v_ref, o_ref, m_scr, l_scr, acc_scr,
               kvm_ref=kvm_ref, qm_ref=qm_ref, **kw)


def _unmasked_kernel(q_ref, k_ref, v_ref, o_ref, m_scr, l_scr, acc_scr, **kw):
    _attn_step(q_ref, k_ref, v_ref, o_ref, m_scr, l_scr, acc_scr, **kw)


# --------------------------------------------------------------------------
# Wrapper
# --------------------------------------------------------------------------
def _round_up(x, m):
    return (x + m - 1) // m * m


def _block_and_pad(dim, preferred):
    if dim <= preferred:
        return dim, dim                       # whole dim as one block (always legal)
    return preferred, _round_up(dim, preferred)


def full_attention(queries, keys, values, q_mask=None, kv_mask=None, *,
                   block_l=1024, block_s=1024, mxu_dtype=jnp.bfloat16,
                   exp_dtype=None):
    """LoFTR FullAttention forward.

    queries: [N, L, H, D], keys/values: [N, S, H, D], masks: [N, L] / [N, S].
    Returns [N, L, H, D].  Masks only apply when kv_mask is given (PyTorch
    semantics); rows that are fully masked (by q_mask or by an all-False
    kv_mask row) are returned as 0 instead of PyTorch's NaN.
    mxu_dtype controls the matmul input dtype (f32 accumulation); default bf16.
    exp_dtype=jnp.bfloat16 optionally runs the big exp in bf16 (v6e/v7x EUP).
    """
    N, L, H, D = queries.shape
    S = keys.shape[1]
    out_dtype = queries.dtype
    softmax_temp = 1.0 / (D ** 0.5)
    scale = softmax_temp * _LOG2E             # scores land in log2 domain -> exp2 in kernel
    compute_dtype = mxu_dtype if mxu_dtype is not None else queries.dtype

    # ---- tile sizes / padding -------------------------------------------
    bl, Lp = _block_and_pad(L, block_l)
    if bl != Lp and bl % 8:
        bl = _round_up(bl, 8)
        Lp = _round_up(L, bl)
    bs, Sp = _block_and_pad(S, block_s)
    if bs != Sp and bs % 8:
        bs = _round_up(bs, 8)
        Sp = _round_up(S, bs)
    user_masked = kv_mask is not None
    if user_masked and bs != Sp and bs % 128:
        # kv-mask tile is (1, bs): lane dim must be 128-aligned when S is tiled.
        bs = _round_up(bs, 128)
        Sp = _round_up(S, bs)

    # ---- layout: [N, L, H, D] -> [N, H, L, D]; fold scale into the Q cast ----
    # TODO(synk): fuse these transposes into the producing projections.
    q = (jnp.transpose(queries, (0, 2, 1, 3))
         * jnp.asarray(scale, dtype=queries.dtype)).astype(compute_dtype)
    k = jnp.transpose(keys, (0, 2, 1, 3)).astype(compute_dtype)
    v = jnp.transpose(values, (0, 2, 1, 3)).astype(compute_dtype)
    if Lp != L:
        q = jnp.pad(q, ((0, 0), (0, 0), (0, Lp - L), (0, 0)))
    if Sp != S:
        k = jnp.pad(k, ((0, 0), (0, 0), (0, Sp - S), (0, 0)))
        v = jnp.pad(v, ((0, 0), (0, 0), (0, Sp - S), (0, 0)))

    grid = (N, Lp // bl, Sp // bs)

    qkv_specs = [
        pl.BlockSpec((1, H, bl, D), lambda n, li, si: (n, 0, li, 0)),   # Q
        pl.BlockSpec((1, H, bs, D), lambda n, li, si: (n, 0, si, 0)),   # K
        pl.BlockSpec((1, H, bs, D), lambda n, li, si: (n, 0, si, 0)),   # V
    ]
    out_spec = pl.BlockSpec((1, bl, H * D), lambda n, li, si: (n, li, 0))
    scratch = [
        pltpu.VMEM((H, bl, 1), jnp.float32),   # running max m (per head)
        pltpu.VMEM((H, bl, 1), jnp.float32),   # running denom l (per head)
        pltpu.VMEM((H, bl, D), jnp.float32),   # output accumulator (per head)
    ]

    valid_s_last = None
    if not user_masked and Sp != S:
        valid_s_last = S - (Sp // bs - 1) * bs   # valid keys in the last S tile

    common = dict(
        heads=H, head_dim=D, valid_s_last=valid_s_last, exp_dtype=exp_dtype,
        approx_recip=np.dtype(out_dtype) in (np.dtype(jnp.bfloat16),
                                             np.dtype(jnp.float16)))

    # ---- explicit VMEM budget, capped to the real device capacity --------
    itemsize = np.dtype(compute_dtype).itemsize
    out_itemsize = np.dtype(out_dtype).itemsize
    tile_bytes = 2 * (H * bl * D + 2 * H * bs * D) * itemsize        # Q,K,V double buffers
    tile_bytes += 2 * bl * H * D * out_itemsize                      # output buffers
    if user_masked:
        tile_bytes += 2 * (bl + bs) * 4                              # mask tiles
    work_bytes = 3 * bl * bs * 4                                     # scores / p temporaries
    work_bytes += H * bl * D * 4 + 2 * H * bl * 128 * 4              # acc + (lane-padded) m, l
    try:
        vmem_cap = int(pltpu.get_tpu_info().vmem_capacity_bytes)
    except Exception:
        vmem_cap = 64 * 2**20                                        # conservative (v7x)
    vmem_limit = int(max(32 * 2**20,
                         min(tile_bytes + work_bytes + 8 * 2**20,
                             vmem_cap - 12 * 2**20)))

    compiler_params = pltpu.CompilerParams(
        dimension_semantics=("parallel", "parallel", "arbitrary"),
        vmem_limit_bytes=vmem_limit)

    if user_masked:
        qm_f = (jnp.ones((N, L), jnp.float32) if q_mask is None
                else q_mask.astype(jnp.float32))
        kvm_f = kv_mask.astype(jnp.float32)
        if Lp != L:
            qm_f = jnp.pad(qm_f, ((0, 0), (0, Lp - L)))              # padded q rows masked
        if Sp != S:
            kvm_f = jnp.pad(kvm_f, ((0, 0), (0, Sp - S)))            # padded keys masked
        q_rowmask = qm_f.reshape(N, Lp, 1)                           # {0,1} row mask
        kv_colmask = kvm_f.reshape(N, 1, Sp)                         # {0,1} column mask
        in_specs = [
            pl.BlockSpec((1, bl, 1), lambda n, li, si: (n, li, 0)),  # q row mask
            pl.BlockSpec((1, 1, bs), lambda n, li, si: (n, 0, si)),  # kv column mask
        ] + qkv_specs
        kernel = functools.partial(_masked_kernel, **common)
        operands = (q_rowmask, kv_colmask, q, k, v)
    else:
        in_specs = qkv_specs
        kernel = functools.partial(_unmasked_kernel, **common)
        operands = (q, k, v)

    out = pl.pallas_call(
        kernel,
        out_shape=jax.ShapeDtypeStruct((N, Lp, H * D), out_dtype),
        grid=grid,
        in_specs=in_specs,
        out_specs=out_spec,
        scratch_shapes=scratch,
        compiler_params=compiler_params,
    )(*operands)

    # Lane order inside the slab is (head, dim) -> plain reshape, no transpose.
    out = out.reshape(N, Lp, H, D)
    if Lp != L:
        out = out[:, :L]
    return out


# --------------------------------------------------------------------------
# Pure-JAX reference (transcription of the PyTorch forward)
# --------------------------------------------------------------------------
def _reference_attention(queries, keys, values, q_mask=None, kv_mask=None):
    QK = jnp.einsum('nlhd,nshd->nlsh', queries, keys)
    if kv_mask is not None:
        mask = q_mask[:, :, None, None] & kv_mask[:, None, :, None]
        QK = jnp.where(mask, QK, -jnp.inf)
    softmax_temp = 1.0 / queries.shape[3] ** 0.5
    A = jax.nn.softmax(softmax_temp * QK, axis=2)
    return jnp.einsum('nlsh,nshd->nlhd', A, values)


# --------------------------------------------------------------------------
# Self-test
# --------------------------------------------------------------------------
if __name__ == "__main__":
    root = jax.random.PRNGKey(0)
    key_small, key_big = jax.random.split(root)

    def make_inputs(key, N, L, S, H, D):
        kq, kk, kv = jax.random.split(key, 3)
        return (jax.random.normal(kq, (N, L, H, D), dtype=jnp.float32),
                jax.random.normal(kk, (N, S, H, D), dtype=jnp.float32),
                jax.random.normal(kv, (N, S, H, D), dtype=jnp.float32))

    # --- 1) small masked case (single tile), exact f32 MXU path -----------
    N, L, S, H, D = 2, 16, 16, 2, 32
    queries, keys, values = make_inputs(key_small, N, L, S, H, D)
    q_mask = jnp.ones((N, L), dtype=bool)
    kv_mask = jnp.concatenate(
        [jnp.ones((N, S - 3), dtype=bool), jnp.zeros((N, 3), dtype=bool)], axis=1)

    out = jax.block_until_ready(
        full_attention(queries, keys, values, q_mask, kv_mask,
                       mxu_dtype=jnp.float32))
    ref = _reference_attention(queries, keys, values, q_mask, kv_mask)
    np.testing.assert_allclose(np.asarray(out), np.asarray(ref), rtol=2e-5, atol=2e-5)
    assert out.shape == (N, L, H, D)

    # --- 2) small unmasked case, f32 path ----------------------------------
    out = jax.block_until_ready(
        full_attention(queries, keys, values, mxu_dtype=jnp.float32))
    ref = _reference_attention(queries, keys, values)
    np.testing.assert_allclose(np.asarray(out), np.asarray(ref), rtol=2e-5, atol=2e-5)

    # --- 3) tiled + masked (padding on both L and S), f32 path -------------
    N, L, S, H, D = 2, 56, 200, 2, 32
    queries, keys, values = make_inputs(key_big, N, L, S, H, D)
    q_mask = jnp.ones((N, L), dtype=bool)
    kv_mask = jnp.concatenate(
        [jnp.ones((N, S - 37), dtype=bool), jnp.zeros((N, 37), dtype=bool)], axis=1)

    out = jax.block_until_ready(
        full_attention(queries, keys, values, q_mask, kv_mask,
                       block_l=32, block_s=128, mxu_dtype=jnp.float32))
    ref_masked = _reference_attention(queries, keys, values, q_mask, kv_mask)
    np.testing.assert_allclose(np.asarray(out), np.asarray(ref_masked),
                               rtol=1e-4, atol=1e-4)

    # --- 4) tiled + unmasked with S padding (iota pad-mask path), f32 ------
    out = jax.block_until_ready(
        full_attention(queries, keys, values,
                       block_l=32, block_s=128, mxu_dtype=jnp.float32))
    ref_unmasked = _reference_attention(queries, keys, values)
    np.testing.assert_allclose(np.asarray(out), np.asarray(ref_unmasked),
                               rtol=1e-4, atol=1e-4)

    # --- 5) default bf16 MXU path (fast path), loose tolerance -------------
    out = jax.block_until_ready(
        full_attention(queries, keys, values, q_mask, kv_mask,
                       block_l=32, block_s=128))
    np.testing.assert_allclose(np.asarray(out), np.asarray(ref_masked),
                               rtol=6e-2, atol=6e-2)

    # --- 6) fully key-masked rows return 0 (PyTorch would give NaN) --------
    kv_mask_all0 = kv_mask.at[0].set(False)
    out = jax.block_until_ready(
        full_attention(queries, keys, values, q_mask, kv_mask_all0,
                       block_l=32, block_s=128, mxu_dtype=jnp.float32))
    assert bool(jnp.all(jnp.isfinite(out)))
    assert float(jnp.max(jnp.abs(out[0]))) == 0.0
    np.testing.assert_allclose(np.asarray(out[1]), np.asarray(ref_masked)[1],
                               rtol=1e-4, atol=1e-4)

    print("KERNEL_OK")
</pallas_src>

<mosaic_0001>
module attributes {stable_mosaic.version = 11 : i64} {
  func.func @_masked_kernel(%arg0: i32, %arg1: i32, %arg2: i32, %arg3: memref<1x16x1xf32, #tpu.memory_space<vmem>>, %arg4: memref<1x1x16xf32, #tpu.memory_space<vmem>>, %arg5: memref<1x2x16x32xf32, #tpu.memory_space<vmem>>, %arg6: memref<1x2x16x32xf32, #tpu.memory_space<vmem>>, %arg7: memref<1x2x16x32xf32, #tpu.memory_space<vmem>>, %arg8: memref<1x16x64xf32, #tpu.memory_space<vmem>>, %arg9: memref<2x16x1xf32, #tpu.memory_space<vmem>>, %arg10: memref<2x16x1xf32, #tpu.memory_space<vmem>>, %arg11: memref<2x16x32xf32, #tpu.memory_space<vmem>>) attributes {dimension_semantics = [#tpu.dimension_semantics<parallel>, #tpu.dimension_semantics<parallel>, #tpu.dimension_semantics<arbitrary>], iteration_bounds = array<i64: 2, 1, 1>, scalar_prefetch = 0 : i64, scratch_operands = 3 : i64, tpu.core_type = #tpu.core_type<tc>, window_params = [{transform_indices = @transform_0, window_bounds = array<i64: 1, 16, 1>}, {transform_indices = @transform_1, window_bounds = array<i64: 1, 1, 16>}, {transform_indices = @transform_2, window_bounds = array<i64: 1, 2, 16, 32>}, {transform_indices = @transform_3, window_bounds = array<i64: 1, 2, 16, 32>}, {transform_indices = @transform_4, window_bounds = array<i64: 1, 2, 16, 32>}, {transform_indices = @transform_5, window_bounds = array<i64: 1, 16, 64>}]} {
    %c0_i32 = arith.constant 0 : i32
    %0 = arith.cmpi eq, %arg2, %c0_i32 : i32
    %1 = arith.extui %0 : i1 to i32
    %c0_i32_0 = arith.constant 0 : i32
    %2 = arith.cmpi ne, %1, %c0_i32_0 : i32
    scf.if %2 {
      %cst_71 = arith.constant 0xFF800000 : f32
      %88 = vector.broadcast %cst_71 : f32 to vector<2x16x1xf32>
      %c0_72 = arith.constant 0 : index
      %c0_73 = arith.constant 0 : index
      %c0_74 = arith.constant 0 : index
      %89 = vector.load %arg9[%c0_72, %c0_73, %c0_74] : memref<2x16x1xf32, #tpu.memory_space<vmem>>, vector<2x16x1xf32>
      tpu.vector_store %arg9[%c0_72, %c0_73, %c0_74], %88 {strides = array<i32>} : memref<2x16x1xf32, #tpu.memory_space<vmem>>, vector<2x16x1xf32>,
      %cst_75 = arith.constant 0.000000e+00 : f32
      %90 = vector.broadcast %cst_75 : f32 to vector<2x16x1xf32>
      %c0_76 = arith.constant 0 : index
      %c0_77 = arith.constant 0 : index
      %c0_78 = arith.constant 0 : index
      %91 = vector.load %arg10[%c0_76, %c0_77, %c0_78] : memref<2x16x1xf32, #tpu.memory_space<vmem>>, vector<2x16x1xf32>
      tpu.vector_store %arg10[%c0_76, %c0_77, %c0_78], %90 {strides = array<i32>} : memref<2x16x1xf32, #tpu.memory_space<vmem>>, vector<2x16x1xf32>,
      %cst_79 = arith.constant 0.000000e+00 : f32
      %92 = vector.broadcast %cst_79 : f32 to vector<2x16x32xf32>
      %c0_80 = arith.constant 0 : index
      %c0_81 = arith.constant 0 : index
      %c0_82 = arith.constant 0 : index
      %93 = vector.load %arg11[%c0_80, %c0_81, %c0_82] : memref<2x16x32xf32, #tpu.memory_space<vmem>>, vector<2x16x32xf32>
      tpu.vector_store %arg11[%c0_80, %c0_81, %c0_82], %92 {strides = array<i32>} : memref<2x16x32xf32, #tpu.memory_space<vmem>>, vector<2x16x32xf32>,
    } else {
    }
    %c0 = arith.constant 0 : index
    %c0_1 = arith.constant 0 : index
    %c0_2 = arith.constant 0 : index
    %3 = vector.load %arg4[%c0, %c0_1, %c0_2] : memref<1x1x16xf32, #tpu.memory_space<vmem>>, vector<1x1x16xf32>
    %4 = vector.shape_cast %3 : vector<1x1x16xf32> to vector<1x16xf32>
    %c0_3 = arith.constant 0 : index
    %c0_4 = arith.constant 0 : index
    %c0_5 = arith.constant 0 : index
    %c0_6 = arith.constant 0 : index
    %5 = vector.load %arg5[%c0_3, %c0_4, %c0_5, %c0_6] : memref<1x2x16x32xf32, #tpu.memory_space<vmem>>, vector<1x1x16x32xf32>
    %6 = vector.shape_cast %5 : vector<1x1x16x32xf32> to vector<16x32xf32>
    %c0_7 = arith.constant 0 : index
    %c0_8 = arith.constant 0 : index
    %c0_9 = arith.constant 0 : index
    %c0_10 = arith.constant 0 : index
    %7 = vector.load %arg6[%c0_7, %c0_8, %c0_9, %c0_10] : memref<1x2x16x32xf32, #tpu.memory_space<vmem>>, vector<1x1x16x32xf32>
    %8 = vector.shape_cast %7 : vector<1x1x16x32xf32> to vector<16x32xf32>
    %c0_11 = arith.constant 0 : index
    %c0_12 = arith.constant 0 : index
    %c0_13 = arith.constant 0 : index
    %c0_14 = arith.constant 0 : index
    %9 = vector.load %arg7[%c0_11, %c0_12, %c0_13, %c0_14] : memref<1x2x16x32xf32, #tpu.memory_space<vmem>>, vector<1x1x16x32xf32>
    %10 = vector.shape_cast %9 : vector<1x1x16x32xf32> to vector<16x32xf32>
    %cst = arith.constant dense<0.000000e+00> : vector<16x16xf32>
    %11 = tpu.matmul %6, %8, %cst {dimension_numbers = #tpu.dot_dimension_numbers<[1], [1], [0], [0], [0, 0, 1, 0], [], []>} : vector<16x32xf32>, vector<16x32xf32>, vector<16x16xf32> -> vector<16x16xf32>
    %c0_15 = arith.constant 0 : index
    %c0_16 = arith.constant 0 : index
    %c0_17 = arith.constant 0 : index
    %12 = vector.load %arg9[%c0_15, %c0_16, %c0_17] : memref<2x16x1xf32, #tpu.memory_space<vmem>>, vector<1x16x1xf32>
    %13 = vector.shape_cast %12 : vector<1x16x1xf32> to vector<16x1xf32>
    %cst_18 = arith.constant dense<0xFF800000> : vector<16xf32>
    %14 = vector.multi_reduction <maximumf>, %11, %cst_18 [1] : vector<16x16xf32> to vector<16xf32>
    %15 = vector.shape_cast %14 : vector<16xf32> to vector<16x1xf32>
    %16 = arith.maximumf %13, %15 : vector<16x1xf32>
    %17 = arith.subf %13, %16 : vector<16x1xf32>
    %18 = math.exp2 %17 : vector<16x1xf32>
    %19 = vector.broadcast %16 : vector<16x1xf32> to vector<16x16xf32>
    %20 = arith.subf %11, %19 : vector<16x16xf32>
    %21 = math.exp2 %20 : vector<16x16xf32>
    %22 = vector.broadcast %4 : vector<1x16xf32> to vector<16x16xf32>
    %23 = arith.mulf %21, %22 : vector<16x16xf32>
    %cst_19 = arith.constant dense<0.000000e+00> : vector<16xf32>
    %24 = vector.multi_reduction <add>, %23, %cst_19 [1] : vector<16x16xf32> to vector<16xf32>
    %25 = vector.shape_cast %24 : vector<16xf32> to vector<16x1xf32>
    %c0_20 = arith.constant 0 : index
    %c0_21 = arith.constant 0 : index
    %c0_22 = arith.constant 0 : index
    %26 = vector.load %arg10[%c0_20, %c0_21, %c0_22] : memref<2x16x1xf32, #tpu.memory_space<vmem>>, vector<1x16x1xf32>
    %27 = vector.shape_cast %26 : vector<1x16x1xf32> to vector<16x1xf32>
    %28 = arith.mulf %18, %27 : vector<16x1xf32>
    %29 = arith.addf %28, %25 : vector<16x1xf32>
    %c0_23 = arith.constant 0 : index
    %c0_24 = arith.constant 0 : index
    %c0_25 = arith.constant 0 : index
    %30 = vector.load %arg10[%c0_23, %c0_24, %c0_25] : memref<2x16x1xf32, #tpu.memory_space<vmem>>, vector<1x16x1xf32>
    %31 = vector.shape_cast %30 : vector<1x16x1xf32> to vector<16x1xf32>
    %32 = vector.shape_cast %29 : vector<16x1xf32> to vector<1x16x1xf32>
    tpu.vector_store %arg10[%c0_23, %c0_24, %c0_25], %32 {strides = array<i32>} : memref<2x16x1xf32, #tpu.memory_space<vmem>>, vector<1x16x1xf32>,
    %c0_26 = arith.constant 0 : index
    %c0_27 = arith.constant 0 : index
    %c0_28 = arith.constant 0 : index
    %33 = vector.load %arg11[%c0_26, %c0_27, %c0_28] : memref<2x16x32xf32, #tpu.memory_space<vmem>>, vector<1x16x32xf32>
    %34 = vector.shape_cast %33 : vector<1x16x32xf32> to vector<16x32xf32>
    %35 = vector.broadcast %18 : vector<16x1xf32> to vector<16x32xf32>
    %36 = arith.mulf %35, %34 : vector<16x32xf32>
    %cst_29 = arith.constant dense<0.000000e+00> : vector<16x32xf32>
    %37 = tpu.matmul %23, %10, %cst_29 {dimension_numbers = #tpu.dot_dimension_numbers<[1], [0], [0], [1], [0, 0, 1, 1], [], []>} : vector<16x16xf32>, vector<16x32xf32>, vector<16x32xf32> -> vector<16x32xf32>
    %38 = arith.addf %36, %37 : vector<16x32xf32>
    %c0_30 = arith.constant 0 : index
    %c0_31 = arith.constant 0 : index
    %c0_32 = arith.constant 0 : index
    %39 = vector.load %arg11[%c0_30, %c0_31, %c0_32] : memref<2x16x32xf32, #tpu.memory_space<vmem>>, vector<1x16x32xf32>
    %40 = vector.shape_cast %39 : vector<1x16x32xf32> to vector<16x32xf32>
    %41 = vector.shape_cast %38 : vector<16x32xf32> to vector<1x16x32xf32>
    tpu.vector_store %arg11[%c0_30, %c0_31, %c0_32], %41 {strides = array<i32>} : memref<2x16x32xf32, #tpu.memory_space<vmem>>, vector<1x16x32xf32>,
    %c0_33 = arith.constant 0 : index
    %c0_34 = arith.constant 0 : index
    %c0_35 = arith.constant 0 : index
    %42 = vector.load %arg9[%c0_33, %c0_34, %c0_35] : memref<2x16x1xf32, #tpu.memory_space<vmem>>, vector<1x16x1xf32>
    %43 = vector.shape_cast %42 : vector<1x16x1xf32> to vector<16x1xf32>
    %44 = vector.shape_cast %16 : vector<16x1xf32> to vector<1x16x1xf32>
    tpu.vector_store %arg9[%c0_33, %c0_34, %c0_35], %44 {strides = array<i32>} : memref<2x16x1xf32, #tpu.memory_space<vmem>>, vector<1x16x1xf32>,
    %c0_36 = arith.constant 0 : index
    %c1 = arith.constant 1 : index
    %c0_37 = arith.constant 0 : index
    %c0_38 = arith.constant 0 : index
    %45 = vector.load %arg5[%c0_36, %c1, %c0_37, %c0_38] : memref<1x2x16x32xf32, #tpu.memory_space<vmem>>, vector<1x1x16x32xf32>
    %46 = vector.shape_cast %45 : vector<1x1x16x32xf32> to vector<16x32xf32>
    %c0_39 = arith.constant 0 : index
    %c1_40 = arith.constant 1 : index
    %c0_41 = arith.constant 0 : index
    %c0_42 = arith.constant 0 : index
    %47 = vector.load %arg6[%c0_39, %c1_40, %c0_41, %c0_42] : memref<1x2x16x32xf32, #tpu.memory_space<vmem>>, vector<1x1x16x32xf32>
    %48 = vector.shape_cast %47 : vector<1x1x16x32xf32> to vector<16x32xf32>
    %c0_43 = arith.constant 0 : index
    %c1_44 = arith.constant 1 : index
    %c0_45 = arith.constant 0 : index
    %c0_46 = arith.constant 0 : index
    %49 = vector.load %arg7[%c0_43, %c1_44, %c0_45, %c0_46] : memref<1x2x16x32xf32, #tpu.memory_space<vmem>>, vector<1x1x16x32xf32>
    %50 = vector.shape_cast %49 : vector<1x1x16x32xf32> to vector<16x32xf32>
    %cst_47 = arith.constant dense<0.000000e+00> : vector<16x16xf32>
    %51 = tpu.matmul %46, %48, %cst_47 {dimension_numbers = #tpu.dot_dimension_numbers<[1], [1], [0], [0], [0, 0, 1, 0], [], []>} : vector<16x32xf32>, vector<16x32xf32>, vector<16x16xf32> -> vector<16x16xf32>
    %c1_48 = arith.constant 1 : index
    %c0_49 = arith.constant 0 : index
    %c0_50 = arith.constant 0 : index
    %52 = vector.load %arg9[%c1_48, %c0_49, %c0_50] : memref<2x16x1xf32, #tpu.memory_space<vmem>>, vector<1x16x1xf32>
    %53 = vector.shape_cast %52 : vector<1x16x1xf32> to vector<16x1xf32>
    %cst_51 = arith.constant dense<0xFF800000> : vector<16xf32>
    %54 = vector.multi_reduction <maximumf>, %51, %cst_51 [1] : vector<16x16xf32> to vector<16xf32>
    %55 = vector.shape_cast %54 : vector<16xf32> to vector<16x1xf32>
    %56 = arith.maximumf %53, %55 : vector<16x1xf32>
    %57 = arith.subf %53, %56 : vector<16x1xf32>
    %58 = math.exp2 %57 : vector<16x1xf32>
    %59 = vector.broadcast %56 : vector<16x1xf32> to vector<16x16xf32>
    %60 = arith.subf %51, %59 : vector<16x16xf32>
    %61 = math.exp2 %60 : vector<16x16xf32>
    %62 = vector.broadcast %4 : vector<1x16xf32> to vector<16x16xf32>
    %63 = arith.mulf %61, %62 : vector<16x16xf32>
    %cst_52 = arith.constant dense<0.000000e+00> : vector<16xf32>
    %64 = vector.multi_reduction <add>, %63, %cst_52 [1] : vector<16x16xf32> to vector<16xf32>
    %65 = vector.shape_cast %64 : vector<16xf32> to vector<16x1xf32>
    %c1_53 = arith.constant 1 : index
    %c0_54 = arith.constant 0 : index
    %c0_55 = arith.constant 0 : index
    %66 = vector.load %arg10[%c1_53, %c0_54, %c0_55] : memref<2x16x1xf32, #tpu.memory_space<vmem>>, vector<1x16x1xf32>
    %67 = vector.shape_cast %66 : vector<1x16x1xf32> to vector<16x1xf32>
    %68 = arith.mulf %58, %67 : vector<16x1xf32>
    %69 = arith.addf %68, %65 : vector<16x1xf32>
    %c1_56 = arith.constant 1 : index
    %c0_57 = arith.constant 0 : index
    %c0_58 = arith.constant 0 : index
    %70 = vector.load %arg10[%c1_56, %c0_57, %c0_58] : memref<2x16x1xf32, #tpu.memory_space<vmem>>, vector<1x16x1xf32>
    %71 = vector.shape_cast %70 : vector<1x16x1xf32> to vector<16x1xf32>
    %72 = vector.shape_cast %69 : vector<16x1xf32> to vector<1x16x1xf32>
    tpu.vector_store %arg10[%c1_56, %c0_57, %c0_58], %72 {strides = array<i32>} : memref<2x16x1xf32, #tpu.memory_space<vmem>>, vector<1x16x1xf32>,
    %c1_59 = arith.constant 1 : index
    %c0_60 = arith.constant 0 : index
    %c0_61 = arith.constant 0 : index
    %73 = vector.load %arg11[%c1_59, %c0_60, %c0_61] : memref<2x16x32xf32, #tpu.memory_space<vmem>>, vector<1x16x32xf32>
    %74 = vector.shape_cast %73 : vector<1x16x32xf32> to vector<16x32xf32>
    %75 = vector.broadcast %58 : vector<16x1xf32> to vector<16x32xf32>
    %76 = arith.mulf %75, %74 : vector<16x32xf32>
    %cst_62 = arith.constant dense<0.000000e+00> : vector<16x32xf32>
    %77 = tpu.matmul %63, %50, %cst_62 {dimension_numbers = #tpu.dot_dimension_numbers<[1], [0], [0], [1], [0, 0, 1, 1], [], []>} : vector<16x16xf32>, vector<16x32xf32>, vector<16x32xf32> -> vector<16x32xf32>
    %78 = arith.addf %76, %77 : vector<16x32xf32>
    %c1_63 = arith.constant 1 : index
    %c0_64 = arith.constant 0 : index
    %c0_65 = arith.constant 0 : index
    %79 = vector.load %arg11[%c1_63, %c0_64, %c0_65] : memref<2x16x32xf32, #tpu.memory_space<vmem>>, vector<1x16x32xf32>
    %80 = vector.shape_cast %79 : vector<1x16x32xf32> to vector<16x32xf32>
    %81 = vector.shape_cast %78 : vector<16x32xf32> to vector<1x16x32xf32>
    tpu.vector_store %arg11[%c1_63, %c0_64, %c0_65], %81 {strides = array<i32>} : memref<2x16x32xf32, #tpu.memory_space<vmem>>, vector<1x16x32xf32>,
    %c1_66 = arith.constant 1 : index
    %c0_67 = arith.constant 0 : index
    %c0_68 = arith.constant 0 : index
    %82 = vector.load %arg9[%c1_66, %c0_67, %c0_68] : memref<2x16x1xf32, #tpu.memory_space<vmem>>, vector<1x16x1xf32>
    %83 = vector.shape_cast %82 : vector<1x16x1xf32> to vector<16x1xf32>
    %84 = vector.shape_cast %56 : vector<16x1xf32> to vector<1x16x1xf32>
    tpu.vector_store %arg9[%c1_66, %c0_67, %c0_68], %84 {strides = array<i32>} : memref<2x16x1xf32, #tpu.memory_space<vmem>>, vector<1x16x1xf32>,
    %c0_i32_69 = arith.constant 0 : i32
    %85 = arith.cmpi eq, %arg2, %c0_i32_69 : i32
    %86 = arith.extui %85 : i1 to i32
    %c0_i32_70 = arith.constant 0 : i32
    %87 = arith.cmpi ne, %86, %c0_i32_70 : i32
    scf.if %87 {
      %c0_71 = arith.constant 0 : index
      %c0_72 = arith.constant 0 : index
      %c0_73 = arith.constant 0 : index
      %88 = vector.load %arg10[%c0_71, %c0_72, %c0_73] : memref<2x16x1xf32, #tpu.memory_space<vmem>>, vector<1x16x1xf32>
      %89 = vector.shape_cast %88 : vector<1x16x1xf32> to vector<16x1xf32>
      %cst_74 = arith.constant 0.000000e+00 : f32
      %90 = vector.broadcast %cst_74 : f32 to vector<16x1xf32>
      %91 = arith.cmpf oeq, %89, %90 : vector<16x1xf32>
      %cst_75 = arith.constant 1.000000e+00 : f32
      %92 = vector.broadcast %cst_75 : f32 to vector<16x1xf32>
      %93 = arith.select %91, %92, %89 : vector<16x1xi1>, vector<16x1xf32>
      %c0_76 = arith.constant 0 : index
      %c0_77 = arith.constant 0 : index
      %c0_78 = arith.constant 0 : index
      %94 = vector.load %arg11[%c0_76, %c0_77, %c0_78] : memref<2x16x32xf32, #tpu.memory_space<vmem>>, vector<1x16x32xf32>
      %95 = vector.shape_cast %94 : vector<1x16x32xf32> to vector<16x32xf32>
      %96 = tpu.reciprocal %93 : vector<16x1xf32> -> vector<16x1xf32>
      %97 = vector.broadcast %96 : vector<16x1xf32> to vector<16x32xf32>
      %98 = arith.mulf %95, %97 : vector<16x32xf32>
      %c0_79 = arith.constant 0 : index
      %c0_80 = arith.constant 0 : index
      %c0_81 = arith.constant 0 : index
      %99 = vector.load %arg3[%c0_79, %c0_80, %c0_81] : memref<1x16x1xf32, #tpu.memory_space<vmem>>, vector<1x16x1xf32>
      %100 = vector.shape_cast %99 : vector<1x16x1xf32> to vector<16x1xf32>
      %101 = vector.broadcast %100 : vector<16x1xf32> to vector<16x32xf32>
      %102 = arith.mulf %98, %101 : vector<16x32xf32>
      %c0_82 = arith.constant 0 : index
      %c0_83 = arith.constant 0 : index
      %c0_84 = arith.constant 0 : index
      %103 = vector.load %arg8[%c0_82, %c0_83, %c0_84] : memref<1x16x64xf32, #tpu.memory_space<vmem>>, vector<1x16x32xf32>
      %104 = vector.shape_cast %103 : vector<1x16x32xf32> to vector<16x32xf32>
      %105 = vector.shape_cast %102 : vector<16x32xf32> to vector<1x16x32xf32>
      tpu.vector_store %arg8[%c0_82, %c0_83, %c0_84], %105 {strides = array<i32>} : memref<1x16x64xf32, #tpu.memory_space<vmem>>, vector<1x16x32xf32>,
      %c1_85 = arith.constant 1 : index
      %c0_86 = arith.constant 0 : index
      %c0_87 = arith.constant 0 : index
      %106 = vector.load %arg10[%c1_85, %c0_86, %c0_87] : memref<2x16x1xf32, #tpu.memory_space<vmem>>, vector<1x16x1xf32>
      %107 = vector.shape_cast %106 : vector<1x16x1xf32> to vector<16x1xf32>
      %cst_88 = arith.constant 0.000000e+00 : f32
      %108 = vector.broadcast %cst_88 : f32 to vector<16x1xf32>
      %109 = arith.cmpf oeq, %107, %108 : vector<16x1xf32>
      %cst_89 = arith.constant 1.000000e+00 : f32
      %110 = vector.broadcast %cst_89 : f32 to vector<16x1xf32>
      %111 = arith.select %109, %110, %107 : vector<16x1xi1>, vector<16x1xf32>
      %c1_90 = arith.constant 1 : index
      %c0_91 = arith.constant 0 : index
      %c0_92 = arith.constant 0 : index
      %112 = vector.load %arg11[%c1_90, %c0_91, %c0_92] : memref<2x16x32xf32, #tpu.memory_space<vmem>>, vector<1x16x32xf32>
      %113 = vector.shape_cast %112 : vector<1x16x32xf32> to vector<16x32xf32>
      %114 = tpu.reciprocal %111 : vector<16x1xf32> -> vector<16x1xf32>
      %115 = vector.broadcast %114 : vector<16x1xf32> to vector<16x32xf32>
      %116 = arith.mulf %113, %115 : vector<16x32xf32>
      %c0_93 = arith.constant 0 : index
      %c0_94 = arith.constant 0 : index
      %c0_95 = arith.constant 0 : index
      %117 = vector.load %arg3[%c0_93, %c0_94, %c0_95] : memref<1x16x1xf32, #tpu.memory_space<vmem>>, vector<1x16x1xf32>
      %118 = vector.shape_cast %117 : vector<1x16x1xf32> to vector<16x1xf32>
      %119 = vector.broadcast %118 : vector<16x1xf32> to vector<16x32xf32>
      %120 = arith.mulf %116, %119 : vector<16x32xf32>
      %c0_96 = arith.constant 0 : index
      %c0_97 = arith.constant 0 : index
      %c32 = arith.constant 32 : index
      %121 = vector.load %arg8[%c0_96, %c0_97, %c32] : memref<1x16x64xf32, #tpu.memory_space<vmem>>, vector<1x16x32xf32>
      %122 = vector.shape_cast %121 : vector<1x16x32xf32> to vector<16x32xf32>
      %123 = vector.shape_cast %120 : vector<16x32xf32> to vector<1x16x32xf32>
      tpu.vector_store %arg8[%c0_96, %c0_97, %c32], %123 {strides = array<i32>} : memref<1x16x64xf32, #tpu.memory_space<vmem>>, vector<1x16x32xf32>,
    } else {
    }
    return
  }
  func.func @transform_0(%arg0: i32, %arg1: i32, %arg2: i32) -> (i32, i32, i32) {
    %c0_i32 = arith.constant 0 : i32
    %c0_i32_0 = arith.constant 0 : i32
    return %arg0, %arg1, %c0_i32 : i32, i32, i32
  }
  func.func @transform_1(%arg0: i32, %arg1: i32, %arg2: i32) -> (i32, i32, i32) {
    %c0_i32 = arith.constant 0 : i32
    %c0_i32_0 = arith.constant 0 : i32
    return %arg0, %c0_i32, %arg2 : i32, i32, i32
  }
  func.func @transform_2(%arg0: i32, %arg1: i32, %arg2: i32) -> (i32, i32, i32, i32) {
    %c0_i32 = arith.constant 0 : i32
    %c0_i32_0 = arith.constant 0 : i32
    %c0_i32_1 = arith.constant 0 : i32
    return %arg0, %c0_i32, %arg1, %c0_i32_0 : i32, i32, i32, i32
  }
  func.func @transform_3(%arg0: i32, %arg1: i32, %arg2: i32) -> (i32, i32, i32, i32) {
    %c0_i32 = arith.constant 0 : i32
    %c0_i32_0 = arith.constant 0 : i32
    %c0_i32_1 = arith.constant 0 : i32
    return %arg0, %c0_i32, %arg2, %c0_i32_0 : i32, i32, i32, i32
  }
  func.func @transform_4(%arg0: i32, %arg1: i32, %arg2: i32) -> (i32, i32, i32, i32) {
    %c0_i32 = arith.constant 0 : i32
    %c0_i32_0 = arith.constant 0 : i32
    %c0_i32_1 = arith.constant 0 : i32
    return %arg0, %c0_i32, %arg2, %c0_i32_0 : i32, i32, i32, i32
  }
  func.func @transform_5(%arg0: i32, %arg1: i32, %arg2: i32) -> (i32, i32, i32) {
    %c0_i32 = arith.constant 0 : i32
    %c0_i32_0 = arith.constant 0 : i32
    return %arg0, %arg1, %c0_i32 : i32, i32, i32
  }
}

</mosaic_0001>

<bundles_post_ra>
// kernel: tpu_custom_call.1
= control target key start
LH: loop header
LB: loop body
LE: loop exit
PB: predicated region body
PF: predicated region fallthrough
CT: control target
= control target key end

     0   :  { %s1943_s0 = inlined_call_operand.vmem [shape: f32[2,16,1], index: 0, kind: input, shape index: {}]   ;;  %s1944_s1 = inlined_call_operand.vmem [shape: f32[2,1,16], index: 1, kind: input, shape index: {}]   ;;  %s1945_s2 = inlined_call_operand.hbm [shape: f32[2,2,16,32], index: 2, kind: input, shape index: {}]   ;;  %s1946_s3 = inlined_call_operand.hbm [shape: f32[2,2,16,32], index: 3, kind: input, shape index: {}]   ;;  %s1947_s4 = inlined_call_operand.hbm [shape: f32[2,2,16,32], index: 4, kind: input, shape index: {}]   ;;  %s1948_s5 = inlined_call_operand.hbm [shape: f32[2,16,64], index: 5, kind: output, shape index: {}]  }
   0x1   :  { %1956 = sst [smem:[#allocation20_spill]] %s1946_s3 }
   0x2   :  { %10 = vsyncpa [#allocation6], 0 }
   0x3   :  { %12 = vsyncpa [#allocation6 + $0x1], 0 }
   0x4   :  { %13 = vsyncpa [#allocation9], 0 }
   0x5   :  { %15 = vsyncpa [#allocation9 + $0x1], 0 }
   0x6   :  { %16 = vsyncpa [#allocation7], 0 }
   0x7   :  { %18 = vsyncpa [#allocation7 + $0x1], 0  ;;  %s1612_s18 = smov 0   ;;  %s1614_s19 = smov 0  }
   0x8   :  { %s1616_s20 = smov 0   ;;  %s1618_s21 = smov 0  }
   0x9   :  { %s1620_s22 = smov 0   ;;  %s1622_s23 = smov 0  }
   0xa LB: > { %1957 = sst [smem:[#allocation15_spill]] %s1548_s18  ;;  %s1643_s24 = sadd.s32 4294967295, %s1568_s23   ;;  %s1568_s23 = sphi %s1622_s23, %s24_s23   ;;  %s1564_s22 = sphi %s1620_s22, %s1976_s22   ;;  %s1560_s21 = sphi %s1618_s21, %s1975_s21   ;;  %s1556_s20 = sphi %s1616_s20, %s1979_s20   ;;  %s1552_s19 = sphi %s1614_s19, %s1978_s19   ;;  %s1548_s18 = sphi %s1612_s18, %s1977_s18  }
   0xb   : > { %1958 = sst [smem:[#allocation16_spill]] %s1564_s22  ;;  %s1202_s25 = sadd.s32 4294967294, %s1568_s23  }
   0xc   : > { %s43_s26 = sadd.s32 1, %s1564_s22  ;;  %s108_s27 = sadd.s32 1, %s1556_s20 }
   0xd   : > { %p45_p0 = scmp.ge.s32.totalorder %s43_s26, 2  ;;  %p115_p1 = scmp.ne.s32.totalorder %s1556_s20, %s1552_s19 }
   0xe   : > { %p116_p2 = scmp.eq.s32.totalorder %s1568_s23, 0  ;;  %p121_p3 = scmp.ne.s32.totalorder %s1552_s19, %s1548_s18 }
   0xf   : > { %s1981_s26 = smov (%p45_p0, %s43_s26), 0  ;;  %p122_p5 = scmp.eq.s32.totalorder %s1643_s24, 0 }
  0x10   : > { %1959 = sst [smem:[#allocation17_spill]] %s1981_s26  ;;  %p1655_p4 = por %p116_p2, %p115_p1 }
  0x11   : > { %s103_s29 = ssub.s32 %s1564_s22, %s1981_s26  ;;  %p203_p6 = scmp.eq.s32.totalorder %s1643_s24, 1 }
  0x12   : > { %p106_p7 = scmp.eq.s32.totalorder %s103_s29, 0  ;;  %p1663_p8 = por %p122_p5, %p121_p3 }
  0x13   : > { %p1667_p9 = por %p203_p6, %p115_p1  ;;  %p209_p10 = scmp.eq.s32.totalorder %s1202_s25, 1 }
  0x14   : > { %s1672_s7 = scalar_select %p106_p7, %s1556_s20, %s108_s27  }
  0x15   : > { %p1674_p11 = por %p209_p10, %p121_p3  ;;  %p1316_p13 = scmp.lt.s32.totalorder %s1568_s23, 2 }
  0x16   : > { %1963 = sst [smem:[#allocation18_spill]] %s1672_s7  ;;  %s1949_s9 = sand.u32 1, %s1556_s20  }
  0x17   : > { %s1964_s8 = scalar_select %p1674_p11, 1, 0 }
  0x18   : > { %s1683_s10 = sshll.u32 %s1949_s9, 5  ;;  %s1686_s11 = sshll.u32 %s1564_s22, 9 }
  0x19   : > { %1965 = sst [smem:[#allocation19_spill]] %s1964_s8  ;;  %p1690_p0 = pnand %p1316_p13, %p1655_p4 }
  0x1a   : > { %s274_s13 = sand.u32 1, %s1568_s23   ;;  %s1967_s3 = sld [smem:[#allocation20_spill]] }
  0x1b   : > { %s278_s17 = scalar_lea.vmem [#allocation8], %s1683_s10  ;;  %p1214_p1 = scmp.ge.s32.totalorder %s1568_s23, 1 }
  0x1c   : > { %s287_s25 = sshll.u32 %s278_s17, 4  ;;  %p318_p2 = scmp.lt.s32.totalorder %s1568_s23, 3  ;;  %s288_s25 = int_to_ptr.vmem [resolvable:$true] %s287_s25 }
  0x1d   : > { %s1702_s27 = scalar_lea.sflag [#allocation9], %s274_s13  ;;  %p1402_p3 = pneg %p1690_p0 }
  0x1e   : > { %s1413_s28 = scalar_lea.vmem %s288_s25, 512  ;;  %s1570_s29 = smov [#allocation8]  }
  0x1f   : > { %p1414_p4 = scmp.ne.s32.totalorder %s288_s25, %s1413_s28  ;;  %s1418_s9 = sshll.u32 %s1570_s29, 4  ;;  %s1419_s9 = int_to_ptr.vmem [resolvable:$false] %s1418_s9 }
  0x20   : > { %s286_s16 = scalar_lea.hbm %s1967_s3, %s1686_s11  ;;  %s1420_s14 = scalar_lea.vmem %s1419_s9, 1024 }
  0x21   : > { %p1416_p5 = pnand %p1414_p4, %p1402_p3  ;;  %p1421_p7 = scmp.lt.s32.totalorder %s288_s25, %s1419_s9 }
  0x22   : > { %p1422_p10 = scmp.lt.s32.totalorder %s1420_s14, %s1413_s28 }
  0x23   : > { %p1417_p6 = pneg %p1416_p5 }
  0x24   : > { %p1423_p13 = por %p1422_p10, %p1421_p7 }
  0x26   : > { %p1424_p12 = pnand %p1423_p13, %p1417_p6 }
  0x28   : > { %1427 = shalt.err (!%p1424_p12)
}
  0x29   : > { %s1954_s15 = smov 128   ;;  %s1572_s13 = smov 8  }
  0x2a   : > { %1308 = dma.hbm_to_vmem [thread:$0]  (!%p1690_p0), %s286_s16, 512, %s288_s25, %s1702_s27, %s1954_s15, %s1954_s15, %s1572_s13  }
  0x2b   : > { %p1719_p4 = pnand %p1214_p1, %p318_p2  ;;  %s263_s29 = scalar_lea.hbm %s1945_s2, %s1686_s11 }
  0x2c   : > { %s255_s14 = scalar_lea.vmem [#allocation5], %s1683_s10  ;;  %s309_s7 = scalar_lea.hbm %s1947_s4, %s1686_s11 }
  0x2d   : > { %s264_s3 = sshll.u32 %s255_s14, 4  ;;  %s1969_s8 = sand.u32 1, %s1556_s20   ;;  %s265_s3 = int_to_ptr.vmem [resolvable:$true] %s264_s3 }
  0x2e   : > { %s252_s18 = scalar_lea.sflag [#allocation6], %s1969_s8  ;;  %s1441_s16 = scalar_lea.vmem %s265_s3, 512 }
  0x2f   : > { %p1442_p12 = scmp.ne.s32.totalorder %s265_s3, %s1441_s16  ;;  %s1573_s25 = smov [#allocation5]  }
  0x30   : > { %s1446_s15 = sshll.u32 %s1573_s25, 4  ;;  %s1447_s15 = int_to_ptr.vmem [resolvable:$false] %s1446_s15 }
  0x31   : > { %p1444_p1 = pnand %p1442_p12, %p1402_p3  ;;  %s1448_s17 = scalar_lea.vmem %s1447_s15, 1024 }
  0x32   : > { %p1449_p5 = scmp.lt.s32.totalorder %s265_s3, %s1447_s15  ;;  %p1450_p6 = scmp.lt.s32.totalorder %s1448_s17, %s1441_s16 }
  0x33   : > { %p1445_p2 = pneg %p1444_p1 }
  0x34   : > { %p1451_p7 = por %p1450_p6, %p1449_p5 }
  0x36   : > { %p1452_p10 = pnand %p1451_p7, %p1445_p2 }
  0x38   : > { %1455 = shalt.err (!%p1452_p10)
}
  0x39   : > { %s1970_s22 = smov 128   ;;  %s301_s26 = scalar_lea.vmem [#allocation10], %s1683_s10 }
  0x3a   : > { %1305 = dma.hbm_to_vmem [thread:$0]  (!%p1690_p0), %s263_s29, 512, %s265_s3, %s252_s18, %s1970_s22, %s1970_s22, %s1572_s13  }
  0x3b   : > { %s310_s8 = sshll.u32 %s301_s26, 4  ;;  %s1574_s15 = smov [#allocation10]   ;;  %s311_s8 = int_to_ptr.vmem [resolvable:$true] %s310_s8 }
  0x3c   : > { %s1469_s28 = scalar_lea.vmem %s311_s8, 512  ;;  %s1474_s14 = sshll.u32 %s1574_s15, 4  ;;  %s1475_s14 = int_to_ptr.vmem [resolvable:$false] %s1474_s14 }
  0x3d   : > { %p1470_p13 = scmp.ne.s32.totalorder %s311_s8, %s1469_s28  ;;  %s1476_s16 = scalar_lea.vmem %s1475_s14, 1024 }
  0x3e   : > { %p1477_p2 = scmp.lt.s32.totalorder %s311_s8, %s1475_s14  ;;  %p1478_p5 = scmp.lt.s32.totalorder %s1476_s16, %s1469_s28 }
  0x3f   : > { %p1472_p12 = pnand %p1470_p13, %p1402_p3 }
  0x40   : > { %p1479_p6 = por %p1478_p5, %p1477_p2 }
  0x41   : > { %p1473_p1 = pneg %p1472_p12 }
  0x43   : > { %p1480_p7 = pnand %p1479_p6, %p1473_p1 }
  0x45   : > { %1483 = shalt.err (!%p1480_p7)
}
  0x46   : > { %1311 = dma.hbm_to_vmem [thread:$0]  (!%p1690_p0), %s309_s7, 512, %s311_s8, %s1702_s27, %s1970_s22, %s1970_s22, %s1572_s13  }
  0x47   : > { %322 = sbr.rel (%p1719_p4) target bundleno = 1481 (0x5c9), region = 40  ;;  %s1760_s10 = sand.u32 (!%p1719_p4), 1, %s1552_s19  }
  0x48   : > { %s1763_s12 = sshll.u32 (!%p1719_p4), %s1760_s10, 5  ;;  %s325_s29 = scalar_lea.sflag (!%p1719_p4), [#allocation6], %s1760_s10 }
  0x49   : > { %s1767_s25 = scalar_lea.vmem (!%p1719_p4), [#allocation5], %s1763_s12 }
  0x4c   : > { %1535 = dma.done.wait (%p1663_p8), %s325_s29, 512  }
  0x4d   : > { %1537 = vsyncadd (%p1663_p8), %s325_s29, 4294966784  ;;  %s333_s7 = sand.u32 1, %s1643_s24   ;;  %s1775_s27 = scalar_lea.vmem [#allocation8], %s1763_s12 }
  0x4e   : > { %s334_s11 = scalar_lea.sflag [#allocation9], %s333_s7 }
  0x4f   : > { %1539 = dma.done.wait (%p1663_p8), %s334_s11, 1024  }
  0x50   : > { %1541 = vsyncadd (%p1663_p8), %s334_s11, 4294966272  ;;  %vm431_vm0 = vcmask 261120   ;;  %v440_v0 = vld [vmem:[%s1775_s27 + $0x8] sm:$0xff]  ;;  %v439_v1 = vld [vmem:[%s1775_s27] sm:$0xff]  ;;  %vm422_vm1 = vcmask 7168   ;;  %v1575_v4 = vmov -inf  }
  0x51   : > { %v437_v2 = vld [vmem:[%s1767_s25] sm:$0xff]  ;;  %1266 = vmatprep.subr.msk.mxu0 %vm431_vm0, %v440_v0  ;;  %v438_v3 = vld [vmem:[%s1767_s25 + $0x8] sm:$0xff]  ;;  %423 = vst.msk [vmem:[#allocation2] sm:$0xff] %vm422_vm1, %v1575_v4  ;;  %424 = vst.msk [vmem:[#allocation2 + $0x8] sm:$0xff] %vm422_vm1, %v1575_v4  ;;  %vm533_vm2 = vcmask 130048   ;;  %v1576_v9 = vmov 0  }
  0x52   : > { %1270 = vmatprep.mubr.msk.f32.mxu0 %vm431_vm0, %v437_v2  ;;  %1267 = vmatpush3.xpose.msk.msra.mxu0 %vm431_vm0, %v440_v0  ;;  %425 = vst.msk [vmem:[#allocation2 + $0x10] sm:$0xff] %vm422_vm1, %v1575_v4  ;;  %426 = vst.msk [vmem:[#allocation2 + $0x18] sm:$0xff] %vm422_vm1, %v1575_v4  ;;  %v1577_v10 = vmov 0.0   ;;  %s1821_s24 = scalar_lea.vmem [#allocation10], %s1763_s12  ;;  %v1231_v21 = vld [vmem:[%s1775_s27 + $0x18] sm:$0xff]  ;;  %p399_p8 = scmp.lt.s32.totalorder %s1560_s21, 1 }
  0x53   : > { %1268 = vmatprep.subr.msk.mxu0 %vm431_vm0, %v439_v1  ;;  %1374 = vset.pattern.permute.xlu1 %v1576_v9  ;;  %430 = vst.msk [vmem:[#allocation3 + $0x18] sm:$0xff] %vm422_vm1, %v1577_v10  ;;  %427 = vst.msk [vmem:[#allocation3] sm:$0xff] %vm422_vm1, %v1577_v10  ;;  %v442_v18 = vld [vmem:[%s1821_s24 + $0x8] sm:$0xff]  ;;  %v441_v20 = vld [vmem:[%s1821_s24] sm:$0xff]  ;;  %s1578_s15 = smov 32   ;;  %s1218_s14 = sshll.u32 %s1760_s10, 4 }
  0x54   : > { %1375 = vset.pattern.permute.xlu0 %v1576_v9  ;;  %428 = vst.msk [vmem:[#allocation3 + $0x8] sm:$0xff] %vm422_vm1, %v1577_v10  ;;  %429 = vst.msk [vmem:[#allocation3 + $0x10] sm:$0xff] %vm422_vm1, %v1577_v10  ;;  %1273 = vmatprep.subr.mxu1 %v442_v18  ;;  %s1834_s30 = scalar_select %p399_p8, %s1560_s21, 1  ;;  %v1228_v31 = vld [vmem:[%s1767_s25 + $0x10] sm:$0xff]  ;;  %v1229_v33 = vld [vmem:[%s1767_s25 + $0x18] sm:$0xff]  ;;  %vm1013_vm7 = vcmask 523520  }
  0x55   : > { %432 = vst.msk [vmem:[#allocation4] sm:$0xff] %vm431_vm0, %v1577_v10  ;;  %433 = vst.msk [vmem:[#allocation4 + $0x8] sm:$0xff] %vm431_vm0, %v1577_v10  ;;  %1274 = vmatpush3.msra.mxu1 %v442_v18  ;;  %v1230_v32 = vld [vmem:[%s1775_s27 + $0x10] sm:$0xff]  ;;  %v1233_v47 = vld [vmem:[%s1821_s24 + $0x18] sm:$0xff]  ;;  %s397_s16 = scalar_lea.vmem [#allocation11], %s1218_s14  ;;  %s1249_s3 = sshll.u32 %s1560_s21, 8 }
  0x56   : > { %1269 = vmatpush3.xpose.msk.msra.mxu0 %vm431_vm0, %v439_v1  ;;  %434 = vst.msk [vmem:[#allocation4 + $0x10] sm:$0xff] %vm431_vm0, %v1577_v10  ;;  %435 = vst.msk [vmem:[#allocation4 + $0x18] sm:$0xff] %vm431_vm0, %v1577_v10  ;;  %1275 = vmatprep.subr.mxu1 %v441_v20  ;;  %s413_s17 = scalar_lea.vmem %s1944_s1, %s1834_s30  ;;  %v1232_v48 = vld [vmem:[%s1821_s24 + $0x10] sm:$0xff]  ;;  %s1248_s22 = sshll.u32 %s1834_s30, 4 }
  0x57   : > { %1276 = vmatpush3.msra.mxu1 %v441_v20  ;;  %v1225_v26 = vld [vmem:[%s413_s17] ss:$0 sm:$0xff]  ;;  %1287 = vmatprep.subr.mxu0 %v1233_v47  ;;  %s406_s28 = scalar_lea.vmem %s1943_s0, %s1248_s22  ;;  %s1032_s18 = sshll.u32 %s397_s16, 4  ;;  %s1895_s18 = int_to_ptr.vmem [resolvable:$true] %s1032_s18 }
  0x58   : > { %v1805_v11 = vld [vmem:[#allocation2] sm:$0xff]  ;;  %v1810_v14 = vld [vmem:[#allocation2 + $0x8] sm:$0xff]  ;;  %1280 = vmatprep.subr.msk.mxu1 %vm431_vm0, %v1231_v21  ;;  %s1893_s25 = scalar_lea.hbm %s1948_s5, %s1249_s3  ;;  %s1017_s7 = scalar_lea.sflag [#allocation7], %s1760_s10 }
  0x59   : > { %1271 = vmatmul.mubr.msk.f32.vlgmr.msra.gmra.mxu0 %vm431_vm0, %v438_v3  ;;  %v782_v40 = vld [vmem:[#allocation2 + $0x18] sm:$0xff]  ;;  %v781_v42 = vld [vmem:[#allocation2 + $0x10] sm:$0xff]  ;;  %s1484_s11 = scalar_lea.vmem %s1895_s18, 256  ;;  %s1579_s21 = smov [#allocation11]  }
  0x5a   : > { %1288 = vmatpush3.msra.mxu0 %v1233_v47  ;;  %v819_v0 = vld [vmem:[#allocation3 + $0x18] sm:$0xff]  ;;  %p1485_p0 = scmp.ne.s32.totalorder %s1895_s18, %s1484_s11  ;;  %s1488_s27 = sshll.u32 %s1579_s21, 4  ;;  %s1489_s27 = int_to_ptr.vmem [resolvable:$false] %s1488_s27 }
  0x5b   : > { %1289 = vmatprep.subr.mxu0 %v1232_v48  ;;  %v818_v1 = vld [vmem:[#allocation3 + $0x10] sm:$0xff]  ;;  %s1490_s24 = scalar_lea.vmem %s1489_s27, 512  ;;  %p1491_p10 = scmp.lt.s32.totalorder %s1895_s18, %s1489_s27 }
  0x5c   : > { %1290 = vmatpush3.msra.mxu0 %v1232_v48  ;;  %p1486_p3 = pnand %p1485_p0, %p1667_p9  ;;  %p1492_p13 = scmp.lt.s32.totalorder %s1490_s24, %s1484_s11 }
  0x5e   : > { %p1487_p4 = pneg %p1486_p3  ;;  %p1493_p12 = por %p1492_p13, %p1491_p10 }
  0x60   : > { %p1494_p1 = pnand %p1493_p12, %p1487_p4 }
 0x119   : > { %v1272_v5 = vpop.f32.mrf.mxu0 }
 0x11a   : > { %v537_v8 = vsel %vm533_vm2, %v1272_v5, -inf }
 0x11b   : > { %v522_v6 = vpop.f32.mrf.mxu0 }
 0x11c   : > { %v534_v7 = vsel %vm533_vm2, %v522_v6, -inf }
 0x11d   : > { %535 = vmax.xlane.f32.xlu0 %v534_v7 }
 0x121   : > { %538 = vmax.xlane.f32.xlu0 %v537_v8  ;;  %v574_v8 = vld [vmem:[#allocation3] sm:$0xff] }
 0x1a6   : > { %v536_v12 = vpop.xlane.xlu0 %535 }
 0x1a7   : > { %v1808_v13 = vmax.f32 %v1805_v11, %v536_v12 }
 0x1a9   : > { %v542_v15 = vsub.f32 %v1805_v11, %v1808_v13  ;;  %682 = vst.msk [vmem:[#allocation2] sm:$0xff] %vm422_vm1, %v1808_v13  ;;  %548 = vperm.xlu1 %1374, %v1808_v13   ;;  %v575_v13 = vld [vmem:[#allocation3 + $0x8] sm:$0xff] }
 0x1aa   : > { %v539_v16 = vpop.xlane.xlu0 %538 }
 0x1ab   : > { %v1818_v17 = vmax.f32 %v1810_v14, %v539_v16 }
 0x1ad   : > { %v543_v19 = vsub.f32 %v1810_v14, %v1818_v17  ;;  %683 = vst.msk [vmem:[#allocation2 + $0x8] sm:$0xff] %vm422_vm1, %v1818_v17  ;;  %553 = vperm.xlu1 %1374, %v1818_v17  }
 0x224   : > { %v549_v22 = vpop.permute.xlu1 %548 }
 0x225   : > { %v556_v23 = vsub.f32 %v522_v6, %v549_v22 }
 0x227   : > { %1376 = vpow2.f32 %v556_v23 }
 0x228   : > { %v554_v24 = vpop.permute.xlu1 %553 }
 0x229   : > { %v557_v25 = vsub.f32 %v1272_v5, %v554_v24 }
 0x22b   : > { %1378 = vpow2.f32 %v557_v25 }
 0x234   : > { %v1377_v27 = vpop.eup %1376 }
 0x235   : > { %v566_v28 = vmul.f32 %v1377_v27, %v1225_v26 }
 0x237   : > { %1277 = vmatprep.mubr.msk.f32.mxu1 %vm533_vm2, %v566_v28  ;;  %v568_v60 = vsel %vm533_vm2, %v566_v28, 0.0  ;;  %v992_v28 = vld [vmem:[%s406_s28 + $0x8] sm:$0xff] }
 0x238   : > { %v1379_v29 = vpop.eup %1378 }
 0x239   : > { %v567_v30 = vmul.f32 %v1379_v29, %v1225_v26  ;;  %v991_v29 = vld [vmem:[%s406_s28] sm:$0xff] }
 0x23b   : > { %1278 = vmatmul.mubr.msk.f32.vlgmr.msra.gmra.mxu1 %vm533_vm2, %v567_v30  ;;  %v571_v61 = vsel %vm533_vm2, %v567_v30, 0.0 }
 0x23c   : > { %1281 = vmatpush3.xpose.msk.msra.mxu1 %vm431_vm0, %v1231_v21  ;;  %1284 = vmatprep.mubr.msk.f32.mxu1 %vm431_vm0, %v1228_v31 }
 0x23d   : > { %1282 = vmatprep.subr.msk.mxu1 %vm431_vm0, %v1230_v32 }
 0x240   : > { %1283 = vmatpush3.xpose.msk.msra.mxu1 %vm431_vm0, %v1230_v32  ;;  %v828_v32 = vld [vmem:[#allocation4 + $0x18] sm:$0xff] }
 0x243   : > { %1285 = vmatmul.mubr.msk.f32.vlgmr.msra.gmra.mxu1 %vm431_vm0, %v1229_v33 }
 0x2fb   : > { %v1850_v34 = vpop.f32.mrf.mxu1 }
 0x2fd   : > { %v1852_v35 = vpop.f32.mrf.mxu1 }
 0x303   : > { %v1286_v36 = vpop.f32.mrf.mxu1 }
 0x304   : > { %v786_v37 = vsel %vm533_vm2, %v1286_v36, -inf }
 0x305   : > { %787 = vmax.xlane.f32.xlu1 %v786_v37  ;;  %v771_v38 = vpop.f32.mrf.mxu1 }
 0x306   : > { %v783_v39 = vsel %vm533_vm2, %v771_v38, -inf }
 0x307   : > { %784 = vmax.xlane.f32.xlu0 %v783_v39 }
 0x38e   : > { %v788_v41 = vpop.xlane.xlu1 %787 }
 0x38f   : > { %v790_v43 = vmax.f32 %v782_v40, %v788_v41 }
 0x390   : > { %v785_v44 = vpop.xlane.xlu0 %784 }
 0x391   : > { %v792_v45 = vsub.f32 %v782_v40, %v790_v43  ;;  %927 = vst.msk [vmem:[#allocation2 + $0x18] sm:$0xff] %vm422_vm1, %v790_v43  ;;  %v789_v46 = vmax.f32 %v781_v42, %v785_v44  ;;  %802 = vperm.xlu1 %1374, %v790_v43  }
 0x393   : > { %v791_v49 = vsub.f32 %v781_v42, %v789_v46  ;;  %926 = vst.msk [vmem:[#allocation2 + $0x10] sm:$0xff] %vm422_vm1, %v789_v46  ;;  %797 = vperm.xlu0 %1375, %v789_v46  }
 0x40c   : > { %v803_v50 = vpop.permute.xlu1 %802 }
 0x40d   : > { %v806_v51 = vsub.f32 %v1286_v36, %v803_v50  ;;  %v827_v36 = vld [vmem:[#allocation4 + $0x10] sm:$0xff] }
 0x40e   : > { %v798_v52 = vpop.permute.xlu0 %797 }
 0x40f   : > { %1380 = vpow2.f32 %v806_v51  ;;  %v805_v53 = vsub.f32 %v771_v38, %v798_v52 }
 0x411   : > { %1382 = vpow2.f32 %v805_v53  ;;  %v584_v53 = vld [vmem:[#allocation4 + $0x8] sm:$0xff] }
 0x412   : > { %1384 = vpow2.f32 %v792_v45 }
 0x413   : > { %1386 = vpow2.f32 %v791_v49 }
 0x414   : > { %1388 = vpow2.f32 %v542_v15 }
 0x415   : > { %1390 = vpow2.f32 %v543_v19 }
 0x41c   : > { %v1381_v54 = vpop.eup %1380 }
 0x41d   : > { %v810_v55 = vmul.f32 %v1381_v54, %v1225_v26 }
 0x41e   : > { %v1383_v56 = vpop.eup %1382 }
 0x41f   : > { %v814_v57 = vsel %vm533_vm2, %v810_v55, 0.0  ;;  %v809_v58 = vmul.f32 %v1383_v56, %v1225_v26  ;;  %v1385_v62 = vpop.eup %1384  ;;  %v583_v56 = vld [vmem:[#allocation4] sm:$0xff] }
 0x420   : > { %815 = vadd.xlane.f32.xlu1 %v814_v57  ;;  %v1387_v63 = vpop.eup %1386  ;;  %v821_v2 = vmul.f32 %v1385_v62, %v819_v0 }
 0x421   : > { %1291 = vmatprep.mubr.msk.f32.mxu0 %vm533_vm2, %v809_v58  ;;  %v811_v59 = vsel %vm533_vm2, %v809_v58, 0.0  ;;  %v820_v5 = vmul.f32 %v1387_v63, %v818_v1  ;;  %v1389_v6 = vpop.eup %1388 }
 0x422   : > { %1292 = vmatmul.mubr.msk.f32.vlgmr.msra.gmra.mxu0 %vm533_vm2, %v810_v55  ;;  %812 = vadd.xlane.f32.xlu0 %v811_v59  ;;  %v576_v10 = vmul.f32 %v1389_v6, %v574_v8  ;;  %v1391_v11 = vpop.eup %1390 }
 0x423   : > { %v577_v15 = vmul.f32 %v1391_v11, %v575_v13 }
 0x426   : > { %569 = vadd.xlane.f32.xlu0 %v568_v60 }
 0x42a   : > { %572 = vadd.xlane.f32.xlu0 %v571_v61 }
 0x431   : > { %836 = vperm.xlu1 %1374, %v1385_v62  }
 0x440   : > { %831 = vperm.xlu0 %1375, %v1387_v63  }
 0x4a9   : > { %v816_v3 = vpop.xlane.xlu1 %815 }
 0x4aa   : > { %v823_v4 = vadd.f32 %v821_v2, %v816_v3 }
 0x4ab   : > { %v813_v7 = vpop.xlane.xlu0 %812 }
 0x4ac   : > { %825 = vst.msk [vmem:[#allocation3 + $0x18] sm:$0xff] %vm422_vm1, %v823_v4  ;;  %v822_v9 = vadd.f32 %v820_v5, %v813_v7 }
 0x4ad   : > { %v837_v33 = vpop.permute.xlu1 %836 }
 0x4ae   : > { %824 = vst.msk [vmem:[#allocation3 + $0x10] sm:$0xff] %vm422_vm1, %v822_v9  ;;  %v840_v38 = vmul.f32 %v837_v33, %v828_v32 }
 0x4af   : > { %v570_v12 = vpop.xlane.xlu0 %569 }
 0x4b0   : > { %v578_v14 = vadd.f32 %v576_v10, %v570_v12 }
 0x4b2   : > { %581 = vst.msk [vmem:[#allocation3] sm:$0xff] %vm422_vm1, %v578_v14 }
 0x4b3   : > { %v573_v16 = vpop.xlane.xlu0 %572  ;;  %v970_v17 = vld [vmem:[#allocation3 + $0x18] sm:$0xff] }
 0x4b4   : > { %v579_v18 = vadd.f32 %v577_v15, %v573_v16  ;;  %vm972_vm3 = vcmp.eq.f32.partialorder %v970_v17, 0.0 }
 0x4b5   : > { %v974_v19 = vsel %vm972_vm3, 1.0, %v970_v17  ;;  %v969_v20 = vld [vmem:[#allocation3 + $0x10] sm:$0xff] }
 0x4b6   : > { %582 = vst.msk [vmem:[#allocation3 + $0x8] sm:$0xff] %vm422_vm1, %v579_v18  ;;  %1392 = vrcp.f32 %v974_v19  ;;  %vm971_vm4 = vcmp.eq.f32.partialorder %v969_v20, 0.0 }
 0x4b7   : > { %v973_v21 = vsel %vm971_vm4, 1.0, %v969_v20 }
 0x4b8   : > { %1394 = vrcp.f32 %v973_v21 }
 0x4b9   : > { %v931_v22 = vld [vmem:[#allocation3] sm:$0xff] }
 0x4ba   : > { %vm933_vm6 = vcmp.eq.f32.partialorder %v931_v22, 0.0 }
 0x4bb   : > { %v935_v25 = vsel %vm933_vm6, 1.0, %v931_v22  ;;  %v832_v37 = vpop.permute.xlu0 %831 }
 0x4bc   : > { %v839_v40 = vmul.f32 %v832_v37, %v827_v36 }
 0x4bd   : > { %v932_v23 = vld [vmem:[#allocation3 + $0x8] sm:$0xff] }
 0x4be   : > { %vm934_vm5 = vcmp.eq.f32.partialorder %v932_v23, 0.0 }
 0x4bf   : > { %v936_v24 = vsel %vm934_vm5, 1.0, %v932_v23 }
 0x4c0   : > { %1396 = vrcp.f32 %v936_v24 }
 0x4c1   : > { %1398 = vrcp.f32 %v935_v25 }
 0x4c3   : > { %v1393_v26 = vpop.eup %1392 }
 0x4c4   : > { %986 = vperm.xlu0 %1375, %v1393_v26  }
 0x4c5   : > { %v1395_v27 = vpop.eup %1394 }
 0x4c6   : > { %981 = vperm.xlu1 %1374, %v1395_v27  }
 0x4c8   : > { %1000 = vperm.xlu0 %1375, %v992_v28  }
 0x4ca   : > { %995 = vperm.xlu1 %1374, %v991_v29  }
 0x4cc   : > { %592 = vperm.xlu0 %1375, %v1391_v11  }
 0x4cd   : > { %v1397_v30 = vpop.eup %1396 }
 0x4ce   : > { %587 = vperm.xlu1 %1374, %v1389_v6   ;;  %v1399_v31 = vpop.eup %1398 }
 0x4d0   : > { %948 = vperm.xlu0 %1375, %v1397_v30  }
 0x4d2   : > { %943 = vperm.xlu1 %1374, %v1399_v31  }
 0x4d4   : > { %962 = vperm.xlu0 %1375, %v992_v28  }
 0x4d6   : > { %957 = vperm.xlu1 %1374, %v991_v29  }
 0x4e2   : > { %v1293_v39 = vpop.f32.mrf.mxu0 }
 0x4e3   : > { %v923_v41 = vadd.f32 %v1293_v39, %v840_v38 }
 0x4e4   : > { %v913_v42 = vpop.f32.mrf.mxu0 }
 0x4e5   : > { %925 = vst.msk [vmem:[#allocation4 + $0x18] sm:$0xff] %vm431_vm0, %v923_v41  ;;  %v922_v43 = vadd.f32 %v913_v42, %v839_v40 }
 0x4e7   : > { %924 = vst.msk [vmem:[#allocation4 + $0x10] sm:$0xff] %vm431_vm0, %v922_v43 }
 0x4ec   : > { %v976_v45 = vld [vmem:[#allocation4 + $0x18] sm:$0xff] }
 0x4ee   : > { %v975_v48 = vld [vmem:[#allocation4 + $0x10] sm:$0xff] }
 0x53f   : > { %v987_v44 = vpop.permute.xlu0 %986 }
 0x540   : > { %v990_v47 = vmul.f32 %v987_v44, %v976_v45 }
 0x541   : > { %v982_v46 = vpop.permute.xlu1 %981 }
 0x542   : > { %v989_v50 = vmul.f32 %v982_v46, %v975_v48 }
 0x543   : > { %v1001_v49 = vpop.permute.xlu0 %1000 }
 0x544   : > { %v1004_v51 = vmul.f32 %v1001_v49, %v990_v47 }
 0x545   : > { %v996_v52 = vpop.permute.xlu1 %995 }
 0x546   : > { %v1003_v54 = vmul.f32 %v996_v52, %v989_v50  ;;  %1009 = vrot.lane.b32.xlu0 %v1004_v51, %s1578_s15 }
 0x547   : > { %v593_v55 = vpop.permute.xlu0 %592 }
 0x548   : > { %v596_v57 = vmul.f32 %v593_v55, %v584_v53  ;;  %1007 = vrot.lane.b32.xlu1 %v1003_v54, %s1578_s15 }
 0x549   : > { %v588_v58 = vpop.permute.xlu1 %587 }
 0x54a   : > { %v679_v59 = vadd.f32 %v1850_v34, %v596_v57  ;;  %v595_v60 = vmul.f32 %v588_v58, %v583_v56 }
 0x54b   : > { %v949_v62 = vpop.permute.xlu0 %948 }
 0x54c   : > { %681 = vst.msk [vmem:[#allocation4 + $0x8] sm:$0xff] %vm431_vm0, %v679_v59  ;;  %v678_v61 = vadd.f32 %v1852_v35, %v595_v60 }
 0x54d   : > { %v944_v63 = vpop.permute.xlu1 %943 }
 0x54e   : > { %680 = vst.msk [vmem:[#allocation4] sm:$0xff] %vm431_vm0, %v678_v61 }
 0x54f   : > { %v963_v3 = vpop.permute.xlu0 %962 }
 0x551   : > { %v958_v6 = vpop.permute.xlu1 %957 }
 0x553   : > { %v938_v0 = vld [vmem:[#allocation4 + $0x8] sm:$0xff] }
 0x554   : > { %v952_v1 = vmul.f32 %v949_v62, %v938_v0 }
 0x555   : > { %v937_v2 = vld [vmem:[#allocation4] sm:$0xff] }
 0x556   : > { %v951_v4 = vmul.f32 %v944_v63, %v937_v2  ;;  %v966_v5 = vmul.f32 %v963_v3, %v952_v1 }
 0x558   : > { %968 = vst.msk [vmem:[%s397_s16 + $0x8] sm:$0xff] %vm431_vm0, %v966_v5  ;;  %v965_v34 = vmul.f32 %v958_v6, %v951_v4 }
 0x55a   : > { %967 = vst.msk [vmem:[%s397_s16] sm:$0xff] %vm431_vm0, %v965_v34 }
 0x5b8   : > { %v1010_v35 = vpop.permute.xlu0 %1009 }
 0x5b9   : > { %1015 = vst.msk [vmem:[%s397_s16 + $0x8] sm:$0xff] %vm1013_vm7, %v1010_v35 }
 0x5ba   : > { %v1008_v7 = vpop.permute.xlu1 %1007 }
 0x5bb   : > { %1014 = vst.msk [vmem:[%s397_s16] sm:$0xff] %vm1013_vm7, %v1008_v7 }
 0x5bc   : > { %1497 = shalt.err (!%p1494_p1)
}
 0x5bd   : > { %s1498_s30 = scalar_lea.hbm %s1893_s25, 256  ;;  %s1502_s17 = scalar_lea.hbm %s1948_s5, 512 }
 0x5be   : > { %p1499_p2 = scmp.ne.s32.totalorder %s1893_s25, %s1498_s30  ;;  %p1503_p7 = scmp.lt.s32.totalorder %s1893_s25, %s1948_s5 }
 0x5bf   : > { %p1504_p8 = scmp.lt.s32.totalorder %s1502_s17, %s1498_s30 }
 0x5c0   : > { %p1500_p5 = pnand %p1499_p2, %p1667_p9 }
 0x5c1   : > { %p1505_p0 = por %p1504_p8, %p1503_p7 }
 0x5c2   : > { %p1501_p6 = pneg %p1500_p5 }
 0x5c4   : > { %p1506_p3 = pnand %p1505_p0, %p1501_p6 }
 0x5c6   : > { %1509 = shalt.err (!%p1506_p3)
}
 0x5c7   : > { %s1580_s8 = smov 128   ;;  %s1581_s28 = smov 8  }
 0x5c8   : > { %1300 = dma.vmem_to_hbm [thread:$0]  (%p1667_p9), %s1895_s18, 256, %s1893_s25, %s1017_s7, %s1580_s8, %s1580_s8, %s1581_s28  }
 0x5c9 PF: > { %s1971_s15 = sld [smem:[#allocation15_spill]]  ;;  %p1973_p4 = scmp.ge.s32.totalorder %s1568_s23, 2 }
 0x5cb   : > { %p1313_p10 = pnand %p1973_p4, %p1674_p11 }
 0x5cd   : > { %p1314_p13 = pneg %p1313_p10 }
 0x5cf   : > { %s1047_s16 = sand.u32 1, %s1971_s15  }
 0x5d0   : > { %s1048_s3 = scalar_lea.sflag [#allocation7], %s1047_s16 }
 0x5d1   : > { %1543 = dma.done.wait (%p1314_p13), %s1048_s3, 256  }
 0x5d2   : > { %1545 = vsyncadd (%p1314_p13), %s1048_s3, 4294967040  ;;  %s24_s23 = sadd.s32 1, %s1568_s23   ;;  %s1974_s6 = sld [smem:[#allocation18_spill]] }
 0x5d3   : > { %p21_p12 = scmp.ge.s32.totalorder %s24_s23, 4   ;;  %s1975_s21 = sld [smem:[#allocation16_spill]] }
 0x5d4   : > { %s1976_s22 = sld [smem:[#allocation17_spill]]  ;;  %s1977_s18 = smov %s1552_s19 }
 0x5d5   : > { %s1978_s19 = smov %s1556_s20  ;;  %23 = sbr.rel (!%p21_p12) target bundleno = 10 (0xa), region = 129 }
 0x5d8   : > { %s1979_s20 = smov %s1974_s6 }
 0x5da   :  { %1053 = vsyncpa [#allocation6], 1 }
 0x5db   :  { %1055 = vsyncpa [#allocation6 + $0x1], 1 }
 0x5dc   :  { %1056 = vsyncpa [#allocation9], 1 }
 0x5dd   :  { %1058 = vsyncpa [#allocation9 + $0x1], 1 }
 0x5de   :  { %1059 = vsyncpa [#allocation7], 1 }
 0x5df   :  { %1061 = vsyncpa [#allocation7 + $0x1], 1 }

</bundles_post_ra>
